<compile_context>
chip_gen: v7x
topology: tpu7x:2x2x1
jax: 0.10.0
libtpu: 0.0.40
codegen_flags: <defaults>
</compile_context>

<pallas_src>
import functools

import jax
import jax.numpy as jnp
from jax import lax
from jax.experimental import pallas as pl
from jax.experimental.pallas import tpu as pltpu


def _round_up(x, m):
    return ((x + m - 1) // m) * m


# ----------------------------- VMEM budget helpers -----------------------------

_TPU_VMEM_CAP = None


def _vmem_cap_bytes():
    global _TPU_VMEM_CAP
    if _TPU_VMEM_CAP is None:
        cap = 64 * 1024 * 1024
        try:
            cap = int(getattr(pltpu.get_tpu_info(), "vmem_capacity_bytes", cap))
        except Exception:
            pass
        _TPU_VMEM_CAP = cap
    return _TPU_VMEM_CAP


def _vmem_limit_bytes():
    # Leave headroom below physical VMEM (v5e/v6e: 128 MiB -> 96 MiB, v7x: 64 -> 32 MiB).
    cap = _vmem_cap_bytes()
    return int(max(16 * 1024 * 1024, min(cap - 32 * 1024 * 1024, 96 * 1024 * 1024)))


def _scan_budget_bytes():
    # Budget for streamed/double-buffered blocks + in-kernel gates scratch.
    return max(2 * 1024 * 1024, _vmem_limit_bytes() // 3)


# ----------------------------- tiled multi-operand linear -----------------------------

def _linear_kernel(*refs, n_parts, apply_relu):
    x_refs = refs[0:n_parts]
    w_refs = refs[n_parts:2 * n_parts]
    b_ref = refs[2 * n_parts]
    o_ref = refs[2 * n_parts + 1]
    acc = jnp.dot(x_refs[0][...].astype(jnp.bfloat16), w_refs[0][...],
                  preferred_element_type=jnp.float32)
    for p in range(1, n_parts):
        acc = acc + jnp.dot(x_refs[p][...].astype(jnp.bfloat16), w_refs[p][...],
                            preferred_element_type=jnp.float32)
    acc = acc + b_ref[...]
    if apply_relu:
        acc = jnp.maximum(acc, 0.0)
    o_ref[...] = acc.astype(o_ref.dtype)


def pallas_linear(x_parts, w_parts, b, T, Bp, *, apply_relu=False,
                  out_dtype=jnp.float32):
    """y = sum_p x_parts[p] @ w_parts[p] + b.

    x_parts[p]: (T*Bp, K_p);  w_parts[p]: (K_p, N) bf16;  b: (1, N) f32.
    Row tile is chosen as Bp * (divisor of T) so M is never padded (no HBM copy).
    """
    M = T * Bp
    N = int(w_parts[0].shape[1])
    n_parts = len(x_parts)

    in_bytes = sum(int(p.shape[1]) * p.dtype.itemsize for p in x_parts)
    out_bytes = N * jnp.dtype(out_dtype).itemsize
    bytes_per_row = 2 * (in_bytes + out_bytes)          # double-buffered in + out
    cap_rows = max(Bp, min(4096, _scan_budget_bytes() // max(bytes_per_row, 1)))
    best = 1
    for d in range(1, T + 1):
        if T % d == 0 and Bp * d <= cap_rows:
            best = d
    TM = Bp * best

    kernel = functools.partial(_linear_kernel, n_parts=n_parts, apply_relu=apply_relu)
    in_specs = (
        [pl.BlockSpec((TM, int(p.shape[1])), lambda i: (i, 0)) for p in x_parts]
        + [pl.BlockSpec(tuple(w.shape), lambda i: (0, 0)) for w in w_parts]
        + [pl.BlockSpec((1, N), lambda i: (0, 0))]
    )
    return pl.pallas_call(
        kernel,
        out_shape=jax.ShapeDtypeStruct((M, N), out_dtype),
        grid=(M // TM,),
        in_specs=in_specs,
        out_specs=pl.BlockSpec((TM, N), lambda i: (i, 0)),
        compiler_params=pltpu.CompilerParams(
            dimension_semantics=("parallel",),
            vmem_limit_bytes=_vmem_limit_bytes()),
    )(*x_parts, *w_parts, b)


# ------------- fused (gate-matmul + bidirectional recurrence) time-chunked scan -------------

def _bilstm_fused_kernel(*refs, TT, Bp, Hp, n_parts, T_real, Tp, unroll):
    n = n_parts
    xf_refs = refs[0:n]                       # forward-time input chunk parts (bf16)
    xb_refs = refs[n:2 * n]                   # time-reversed chunk parts (bf16)
    wf_refs = refs[2 * n:3 * n]               # (Hp, 4Hp) bf16 per part, fwd dir
    wb_refs = refs[3 * n:4 * n]               # (Hp, 4Hp) bf16 per part, bwd dir
    (bf_ref, bb_ref, whhf_ref, whhb_ref, h0_ref, c0_ref,
     houtf_ref, houtb_ref, hN_ref, cN_ref,
     gf_s, gb_s, hf_s, cf_s, hb_s, cb_s) = refs[4 * n:]

    c = pl.program_id(0)
    nC = pl.num_programs(0)

    # -- carried state init at the first chunk (persists in scratch across chunks)
    @pl.when(c == 0)
    def _():
        hf_s[...] = h0_ref[0]
        cf_s[...] = c0_ref[0]
        hb_s[...] = h0_ref[1]
        cb_s[...] = c0_ref[1]

    # -- fused gate pre-compute for this chunk (both directions) on the MXU
    def gate_precompute(x_refs, w_refs, b_ref, out_s):
        acc = jnp.dot(x_refs[0][...], w_refs[0][...],
                      preferred_element_type=jnp.float32)
        for p in range(1, n):
            acc = acc + jnp.dot(x_refs[p][...], w_refs[p][...],
                                preferred_element_type=jnp.float32)
        out_s[...] = acc + b_ref[...]

    gate_precompute(xf_refs, wf_refs, bf_ref, gf_s)
    gate_precompute(xb_refs, wb_refs, bb_ref, gb_s)

    needs_mask = (Tp != T_real)               # static: only compiled when time is padded

    def cell(g_x, h_prev, c_prev, whh_ref):
        g = g_x + jnp.dot(h_prev.astype(jnp.bfloat16), whh_ref[...],
                          preferred_element_type=jnp.float32)
        sig = jax.nn.sigmoid(g[:, :3 * Hp])   # gates packed as (i, f, o | g)
        i_g = sig[:, 0 * Hp:1 * Hp]
        f_g = sig[:, 1 * Hp:2 * Hp]
        o_g = sig[:, 2 * Hp:3 * Hp]
        g_g = jnp.tanh(g[:, 3 * Hp:])
        c_new = f_g * c_prev + i_g * g_g
        h_new = o_g * jnp.tanh(c_new)
        return h_new, c_new

    def step(tt, carry):
        hf, cf, hb, cb = carry
        rf = pl.multiple_of(tt * Bp, Bp)
        rb = pl.multiple_of((TT - 1 - tt) * Bp, Bp)
        hf_n, cf_n = cell(gf_s[pl.ds(rf, Bp), :], hf, cf, whhf_ref)
        hb_n, cb_n = cell(gb_s[pl.ds(rb, Bp), :], hb, cb, whhb_ref)
        if needs_mask:
            s = c * TT + tt                   # processing step (both directions)
            vf = s < T_real                   # fwd reads time s
            vb = s >= (Tp - T_real)           # bwd reads time Tp-1-s
            hf_n = jnp.where(vf, hf_n, hf)
            cf_n = jnp.where(vf, cf_n, cf)
            hb_n = jnp.where(vb, hb_n, hb)
            cb_n = jnp.where(vb, cb_n, cb)
        houtf_ref[pl.ds(rf, Bp), :] = hf_n.astype(houtf_ref.dtype)
        houtb_ref[pl.ds(rb, Bp), :] = hb_n.astype(houtb_ref.dtype)
        return (hf_n, cf_n, hb_n, cb_n)

    carry0 = (hf_s[...], cf_s[...], hb_s[...], cb_s[...])
    hf, cf, hb, cb = lax.fori_loop(0, TT, step, carry0, unroll=unroll)

    hf_s[...] = hf
    cf_s[...] = cf
    hb_s[...] = hb
    cb_s[...] = cb

    @pl.when(c == nC - 1)
    def _():
        hN_ref[0] = hf
        hN_ref[1] = hb
        cN_ref[0] = cf
        cN_ref[1] = cb


def _choose_time_chunk(T, per_step_bytes, requested):
    if requested is not None:
        TT = max(1, min(int(requested), T))
    else:
        target = max(1, min(T, _scan_budget_bytes() // max(per_step_bytes, 1)))
        divs = [d for d in range(1, target + 1) if T % d == 0]
        best = divs[-1] if divs else 1
        # Prefer a divisor of T (no padded tail, no per-step masking); only fall back to
        # the raw target if the best divisor would leave the chunk badly undersized.
        TT = best if 2 * best >= target else target
    nC = -(-T // TT)
    return TT, nC, nC * TT


def pallas_bilstm_scan_fused(x_parts, lp, h0, c0, T, Bp, time_chunk=None):
    """One bidirectional LSTM layer (both directions fused in a single sequential scan).

    x_parts: list of flat (T*Bp, Hp) bf16 layer-input slabs (1 part for layer 0,
             2 parts [fwd-hout, bwd-hout] for deeper layers).
    Returns flat houtf, houtb (T*Bp, Hp) bf16 and h_n, c_n (2, Bp, Hp) f32.
    """
    Hp = int(lp["whh_f_t"].shape[0])
    n_parts = len(x_parts)
    in_sizes = [int(p.shape[1]) for p in x_parts]
    sum_in = sum(in_sizes)

    # streamed bytes per timestep: inputs (2 dirs, 2 buffers, bf16) + hout (2 streams,
    # 2 buffers, bf16) + gates scratch (2 dirs, f32)
    per_step = Bp * (8 * sum_in + 8 * Hp + 32 * Hp)
    TT, nC, Tp = _choose_time_chunk(T, per_step, time_chunk)
    if Tp != T:
        x_parts = [jnp.pad(p, ((0, (Tp - T) * Bp), (0, 0))) for p in x_parts]

    # unroll only while the per-direction gate slab comfortably fits the vreg file
    unroll = min(TT, 4) if (Bp * 4 * Hp * 4) <= 64 * 1024 else 1

    kernel = functools.partial(
        _bilstm_fused_kernel, TT=TT, Bp=Bp, Hp=Hp, n_parts=n_parts,
        T_real=T, Tp=Tp, unroll=unroll)

    row_blk = TT * Bp
    in_specs = (
        [pl.BlockSpec((row_blk, in_sizes[p]), lambda c: (c, 0))
         for p in range(n_parts)]
        + [pl.BlockSpec((row_blk, in_sizes[p]), lambda c, n=nC: (n - 1 - c, 0))
           for p in range(n_parts)]
        + [pl.BlockSpec((Hp, 4 * Hp), lambda c: (0, 0)) for _ in range(2 * n_parts)]
        + [pl.BlockSpec((1, 4 * Hp), lambda c: (0, 0))] * 2
        + [pl.BlockSpec((Hp, 4 * Hp), lambda c: (0, 0))] * 2
        + [pl.BlockSpec((2, Bp, Hp), lambda c: (0, 0, 0))] * 2
    )
    out_shape = (
        jax.ShapeDtypeStruct((Tp * Bp, Hp), jnp.bfloat16),
        jax.ShapeDtypeStruct((Tp * Bp, Hp), jnp.bfloat16),
        jax.ShapeDtypeStruct((2, Bp, Hp), jnp.float32),
        jax.ShapeDtypeStruct((2, Bp, Hp), jnp.float32),
    )
    out_specs = [
        pl.BlockSpec((row_blk, Hp), lambda c: (c, 0)),
        pl.BlockSpec((row_blk, Hp), lambda c, n=nC: (n - 1 - c, 0)),
        pl.BlockSpec((2, Bp, Hp), lambda c: (0, 0, 0)),
        pl.BlockSpec((2, Bp, Hp), lambda c: (0, 0, 0)),
    ]
    scratch = [
        pltpu.VMEM((row_blk, 4 * Hp), jnp.float32),   # fwd gates chunk
        pltpu.VMEM((row_blk, 4 * Hp), jnp.float32),   # bwd gates chunk
        pltpu.VMEM((Bp, Hp), jnp.float32),            # hf
        pltpu.VMEM((Bp, Hp), jnp.float32),            # cf
        pltpu.VMEM((Bp, Hp), jnp.float32),            # hb
        pltpu.VMEM((Bp, Hp), jnp.float32),            # cb
    ]
    houtf, houtb, h_n, c_n = pl.pallas_call(
        kernel,
        out_shape=out_shape,
        grid=(nC,),
        in_specs=in_specs,
        out_specs=out_specs,
        scratch_shapes=scratch,
        compiler_params=pltpu.CompilerParams(
            dimension_semantics=("arbitrary",),       # sequential recurrence
            vmem_limit_bytes=_vmem_limit_bytes()),
    )(*x_parts, *x_parts,
      *lp["wih_f_parts"], *lp["wih_b_parts"],
      lp["b_f"], lp["b_b"], lp["whh_f_t"], lp["whh_b_t"], h0, c0)
    if Tp != T:
        houtf = houtf[:T * Bp]
        houtb = houtb[:T * Bp]
    return houtf, houtb, h_n, c_n


# ----------------------------- parameter preparation -----------------------------

def init_params(key, n_input, n_output, n_hidden, n_rnn_layer=2):
    """Deterministic PyTorch-layout parameters (same init ranges as nn.Linear/nn.LSTM)."""
    keys = iter(jax.random.split(key, 64))

    def u(k, shape, bound):
        return jax.random.uniform(k, shape, jnp.float32, -bound, bound)

    k_in = 1.0 / float(jnp.sqrt(jnp.float32(n_input)))
    k_h = 1.0 / float(jnp.sqrt(jnp.float32(n_hidden)))
    k_h2 = 1.0 / float(jnp.sqrt(jnp.float32(2 * n_hidden)))

    params = {
        "linear1_w": u(next(keys), (n_hidden, n_input), k_in),
        "linear1_b": u(next(keys), (n_hidden,), k_in),
        "linear2_w": u(next(keys), (n_output, 2 * n_hidden), k_h2),
        "linear2_b": u(next(keys), (n_output,), k_h2),
        "lstm": [],
    }
    for layer in range(n_rnn_layer):
        in_sz = n_hidden if layer == 0 else 2 * n_hidden
        dirs = []
        for _ in range(2):  # forward, backward
            dirs.append({
                "w_ih": u(next(keys), (4 * n_hidden, in_sz), k_h),
                "w_hh": u(next(keys), (4 * n_hidden, n_hidden), k_h),
                "b_ih": u(next(keys), (4 * n_hidden,), k_h),
                "b_hh": u(next(keys), (4 * n_hidden,), k_h),
            })
        params["lstm"].append(dirs)
    return params


def prepare_params(raw, n_input, n_output, n_hidden):
    """Pad to lane/sublane-friendly shapes, reorder gates to (i,f,o,g), transpose, cast
    matmul weights to bf16, split K of multi-input matmuls so no concatenate is needed."""
    H = n_hidden
    Hp = _round_up(H, 128)
    Op = _round_up(n_output, 128)

    def pad_gate_mat(w):            # (4H, c<=H) -> (4Hp, Hp), per-gate row padding
        out = jnp.zeros((4 * Hp, Hp), w.dtype)
        for g in range(4):
            out = out.at[g * Hp:g * Hp + H, :w.shape[1]].set(w[g * H:(g + 1) * H])
        return out

    def pad_gate_vec(v):            # (4H,) -> (4Hp,)
        out = jnp.zeros((4 * Hp,), v.dtype)
        for g in range(4):
            out = out.at[g * Hp:g * Hp + H].set(v[g * H:(g + 1) * H])
        return out

    def reorder(w):                 # PyTorch (i, f, g, o) -> (i, f, o, g) along axis 0
        return jnp.concatenate([w[:2 * H], w[3 * H:], w[2 * H:3 * H]], axis=0)

    kp = {"n_hidden": H, "n_output": n_output, "Hp": Hp, "Op": Op,
          "n_layers": len(raw["lstm"])}

    # linear1: keep K = n_input unpadded (equals full array dim), pad rows H -> Hp
    w1 = jnp.zeros((Hp, n_input), jnp.float32).at[:H, :].set(raw["linear1_w"])
    kp["w1_t"] = w1.T.astype(jnp.bfloat16)                                    # (F, Hp)
    kp["b1"] = jnp.zeros((1, Hp), jnp.float32).at[0, :H].set(raw["linear1_b"])

    # linear2: split K into fwd/bwd halves so hout halves are consumed without concat
    def pad_out_half(wh):           # (n_output, H) -> (Op, Hp)
        return jnp.zeros((Op, Hp), wh.dtype).at[:n_output, :H].set(wh)
    kp["w2a_t"] = pad_out_half(raw["linear2_w"][:, :H]).T.astype(jnp.bfloat16)
    kp["w2b_t"] = pad_out_half(raw["linear2_w"][:, H:]).T.astype(jnp.bfloat16)
    kp["b2"] = jnp.zeros((1, Op), jnp.float32).at[0, :n_output].set(raw["linear2_b"])

    kp["lstm"] = []
    for layer, dirs in enumerate(raw["lstm"]):
        n_parts = 1 if layer == 0 else 2
        lp = {}
        for d, p in enumerate(dirs):                    # d=0 forward, d=1 backward
            w_ih = reorder(p["w_ih"])                   # (4H, in_sz)
            w_hh = reorder(p["w_hh"])                   # (4H, H)
            bias = reorder(p["b_ih"] + p["b_hh"])       # (4H,)
            parts = []
            for q in range(n_parts):
                wq = w_ih[:, q * H:(q + 1) * H]
                parts.append(pad_gate_mat(wq).T.astype(jnp.bfloat16))         # (Hp, 4Hp)
            whh_t = pad_gate_mat(w_hh).T.astype(jnp.bfloat16)                 # (Hp, 4Hp)
            b_pad = pad_gate_vec(bias).reshape(1, 4 * Hp).astype(jnp.float32)
            if d == 0:
                lp["wih_f_parts"], lp["whh_f_t"], lp["b_f"] = parts, whh_t, b_pad
            else:
                lp["wih_b_parts"], lp["whh_b_t"], lp["b_b"] = parts, whh_t, b_pad
        kp["lstm"].append(lp)
    return kp


# ----------------------------- model forward -----------------------------

def rnn_forward(kp, x, seq_lengths=None, h=None, time_chunk=None):
    """Mirror of RNN.forward (eval mode).  x: (T, B, n_input), time-major."""
    T, B, F = x.shape
    H, Hp, Op = kp["n_hidden"], kp["Hp"], kp["Op"]
    n_layers = kp["n_layers"]
    Bp = _round_up(max(B, 1), 8)

    # TODO(synk): pack_padded_sequence / pad_packed_sequence (variable-length packing)
    # has no clean Pallas equivalent; seq_lengths is not supported.
    output_lengths = None

    xp = x if Bp == B else jnp.zeros((T, Bp, F), x.dtype).at[:, :B, :].set(x)

    # linear1 + relu  (nn.Dropout(p=0.4) is identity in eval/inference mode);
    # activation stored as a flat lane-dense bf16 slab.
    d0 = pallas_linear([xp.reshape(T * Bp, F)], [kp["w1_t"]], kp["b1"], T, Bp,
                       apply_relu=True, out_dtype=jnp.bfloat16)       # (T*Bp, Hp)

    if h is None:
        h0_all = jnp.zeros((2 * n_layers, Bp, Hp), jnp.float32)
        c0_all = h0_all
    else:
        h0_raw, c0_raw = h
        h0_all = jnp.zeros((2 * n_layers, Bp, Hp), jnp.float32).at[:, :B, :H].set(h0_raw)
        c0_all = jnp.zeros((2 * n_layers, Bp, Hp), jnp.float32).at[:, :B, :H].set(c0_raw)

    layer_parts = [d0]
    h_ns, c_ns = [], []
    for layer in range(n_layers):
        lp = kp["lstm"][layer]
        houtf, houtb, hN, cN = pallas_bilstm_scan_fused(
            layer_parts, lp,
            h0_all[2 * layer:2 * layer + 2], c0_all[2 * layer:2 * layer + 2],
            T, Bp, time_chunk=time_chunk)
        h_ns.append(hN)
        c_ns.append(cN)
        layer_parts = [houtf, houtb]            # no concatenate: consumed as two parts

    out = pallas_linear(layer_parts, [kp["w2a_t"], kp["w2b_t"]], kp["b2"], T, Bp,
                        apply_relu=False, out_dtype=jnp.float32)      # (T*Bp, Op)
    out = out.reshape(T, Bp, Op)[:, :B, :kp["n_output"]]

    h_n = jnp.concatenate(h_ns, axis=0)[:, :B, :H]
    c_n = jnp.concatenate(c_ns, axis=0)[:, :B, :H]
    return out, output_lengths, (h_n, c_n)


# ----------------------------- pure-JAX reference -----------------------------

def rnn_forward_ref(raw, x):
    """f32 reference with PyTorch semantics (eval mode, zero initial state)."""
    T, B, _ = x.shape
    H = raw["linear1_w"].shape[0]
    layer_in = jnp.maximum(x @ raw["linear1_w"].T + raw["linear1_b"], 0.0)
    h_ns, c_ns = [], []
    for dirs in raw["lstm"]:
        outs = []
        for d, p in enumerate(dirs):
            w_ih, w_hh = p["w_ih"], p["w_hh"]
            b = p["b_ih"] + p["b_hh"]

            def step(carry, x_t, w_ih=w_ih, w_hh=w_hh, b=b):
                hh, cc = carry
                g = x_t @ w_ih.T + hh @ w_hh.T + b
                i = jax.nn.sigmoid(g[:, :H])
                f = jax.nn.sigmoid(g[:, H:2 * H])
                gg = jnp.tanh(g[:, 2 * H:3 * H])
                o = jax.nn.sigmoid(g[:, 3 * H:4 * H])
                cc = f * cc + i * gg
                hh = o * jnp.tanh(cc)
                return (hh, cc), hh

            xs = layer_in if d == 0 else layer_in[::-1]
            init = (jnp.zeros((B, H), jnp.float32), jnp.zeros((B, H), jnp.float32))
            (h_f, c_f), hs = lax.scan(step, init, xs)
            hs = hs if d == 0 else hs[::-1]
            outs.append(hs)
            h_ns.append(h_f)
            c_ns.append(c_f)
        layer_in = jnp.concatenate(outs, axis=-1)
    out = layer_in @ raw["linear2_w"].T + raw["linear2_b"]
    return out, (jnp.stack(h_ns), jnp.stack(c_ns))


# ----------------------------- demo -----------------------------

if __name__ == "__main__":
    key = jax.random.PRNGKey(0)
    pkey, xkey = jax.random.split(key)

    n_input, n_output, n_hidden = 12, 16, 32
    T, B = 8, 4

    raw = init_params(pkey, n_input, n_output, n_hidden)
    kp = prepare_params(raw, n_input, n_output, n_hidden)
    x = jax.random.normal(xkey, (T, B, n_input), jnp.float32)

    out, output_lengths, (h_n, c_n) = rnn_forward(kp, x)
    jax.block_until_ready((out, h_n, c_n))

    assert out.shape == (T, B, n_output)
    assert h_n.shape == (4, B, n_hidden)      # num_layers * num_directions
    assert c_n.shape == (4, B, n_hidden)
    assert output_lengths is None

    # correctness vs. pure-JAX f32 reference (bf16 weights/activations => loose tol)
    out_ref, (h_ref, c_ref) = rnn_forward_ref(raw, x)
    assert jnp.allclose(out, out_ref, atol=5e-2, rtol=5e-2), \
        float(jnp.max(jnp.abs(out - out_ref)))
    assert jnp.allclose(h_n, h_ref, atol=5e-2, rtol=5e-2), \
        float(jnp.max(jnp.abs(h_n - h_ref)))
    assert jnp.allclose(c_n, c_ref, atol=1e-1, rtol=5e-2), \
        float(jnp.max(jnp.abs(c_n - c_ref)))

    # Exercise the multi-chunk + masked-tail scan path and check self-consistency
    # against the single-chunk path (identical per-step math => should match).
    T2 = 10
    x2 = jax.random.normal(jax.random.PRNGKey(1), (T2, B, n_input), jnp.float32)
    out_a, _, (h_a, c_a) = rnn_forward(kp, x2)                 # single chunk (TT = T2)
    out_b, _, (h_b, c_b) = rnn_forward(kp, x2, time_chunk=4)   # 3 chunks, padded to 12
    jax.block_until_ready((out_a, out_b))
    assert jnp.allclose(out_a, out_b, atol=2e-3, rtol=2e-3)
    assert jnp.allclose(h_a, h_b, atol=2e-3, rtol=2e-3)
    assert jnp.allclose(c_a, c_b, atol=2e-3, rtol=2e-3)

    print("KERNEL_OK")
</pallas_src>

<mosaic_0001>
module attributes {stable_mosaic.version = 11 : i64} {
  func.func @_linear_kernel(%arg0: i32, %arg1: memref<64x12xf32, #tpu.memory_space<vmem>>, %arg2: memref<12x128xbf16, #tpu.memory_space<vmem>>, %arg3: memref<1x128xf32, #tpu.memory_space<vmem>>, %arg4: memref<64x128xbf16, #tpu.memory_space<vmem>>) attributes {dimension_semantics = [#tpu.dimension_semantics<parallel>], iteration_bounds = array<i64: 1>, scalar_prefetch = 0 : i64, scratch_operands = 0 : i64, tpu.core_type = #tpu.core_type<tc>, window_params = [{transform_indices = @transform_0, window_bounds = array<i64: 64, 12>}, {pipeline_mode = #tpu.pipeline_mode<synchronous>, transform_indices = @transform_1, window_bounds = array<i64: 12, 128>}, {pipeline_mode = #tpu.pipeline_mode<synchronous>, transform_indices = @transform_2, window_bounds = array<i64: 1, 128>}, {transform_indices = @transform_3, window_bounds = array<i64: 64, 128>}]} {
    %c0 = arith.constant 0 : index
    %c0_0 = arith.constant 0 : index
    %0 = vector.load %arg1[%c0, %c0_0] : memref<64x12xf32, #tpu.memory_space<vmem>>, vector<64x12xf32>
    %1 = arith.truncf %0 : vector<64x12xf32> to vector<64x12xbf16>
    %c0_1 = arith.constant 0 : index
    %c0_2 = arith.constant 0 : index
    %2 = vector.load %arg2[%c0_1, %c0_2] : memref<12x128xbf16, #tpu.memory_space<vmem>>, vector<12x128xbf16>
    %cst = arith.constant dense<0.000000e+00> : vector<64x128xf32>
    %3 = tpu.matmul %1, %2, %cst {dimension_numbers = #tpu.dot_dimension_numbers<[1], [0], [0], [1], [0, 0, 1, 1], [], []>} : vector<64x12xbf16>, vector<12x128xbf16>, vector<64x128xf32> -> vector<64x128xf32>
    %c0_3 = arith.constant 0 : index
    %c0_4 = arith.constant 0 : index
    %4 = vector.load %arg3[%c0_3, %c0_4] : memref<1x128xf32, #tpu.memory_space<vmem>>, vector<1x128xf32>
    %5 = vector.broadcast %4 : vector<1x128xf32> to vector<64x128xf32>
    %6 = arith.addf %3, %5 : vector<64x128xf32>
    %cst_5 = arith.constant 0.000000e+00 : f32
    %7 = vector.broadcast %cst_5 : f32 to vector<64x128xf32>
    %8 = arith.maximumf %6, %7 : vector<64x128xf32>
    %9 = arith.truncf %8 : vector<64x128xf32> to vector<64x128xbf16>
    %c0_6 = arith.constant 0 : index
    %c0_7 = arith.constant 0 : index
    %10 = vector.load %arg4[%c0_6, %c0_7] : memref<64x128xbf16, #tpu.memory_space<vmem>>, vector<64x128xbf16>
    tpu.vector_store %arg4[%c0_6, %c0_7], %9 {strides = array<i32>} : memref<64x128xbf16, #tpu.memory_space<vmem>>, vector<64x128xbf16>,
    return
  }
  func.func @transform_0(%arg0: i32) -> (i32, i32) {
    %c0_i32 = arith.constant 0 : i32
    %c0_i32_0 = arith.constant 0 : i32
    return %arg0, %c0_i32 : i32, i32
  }
  func.func @transform_1(%arg0: i32) -> (i32, i32) {
    %c0_i32 = arith.constant 0 : i32
    %c0_i32_0 = arith.constant 0 : i32
    %c0_i32_1 = arith.constant 0 : i32
    return %c0_i32, %c0_i32_0 : i32, i32
  }
  func.func @transform_2(%arg0: i32) -> (i32, i32) {
    %c0_i32 = arith.constant 0 : i32
    %c0_i32_0 = arith.constant 0 : i32
    %c0_i32_1 = arith.constant 0 : i32
    return %c0_i32, %c0_i32_0 : i32, i32
  }
  func.func @transform_3(%arg0: i32) -> (i32, i32) {
    %c0_i32 = arith.constant 0 : i32
    %c0_i32_0 = arith.constant 0 : i32
    return %arg0, %c0_i32 : i32, i32
  }
}

</mosaic_0001>

<bundles_post_ra>
// kernel: tpu_custom_call.1
= control target key start
LH: loop header
LB: loop body
LE: loop exit
PB: predicated region body
PF: predicated region fallthrough
CT: control target
= control target key end

     0   :  { %vm55_vm0 = vcmask 1045504   ;;  %vm42_vm1 = vcmask 97280   ;;  %s349_s0 = inlined_call_operand.vmem [shape: f32[64,12], index: 0, kind: input, shape index: {}]   ;;  %s350_s1 = inlined_call_operand.vmem [shape: bf16[12,128], index: 1, kind: input, shape index: {}]   ;;  %s351_s2 = inlined_call_operand.vmem [shape: f32[1,128], index: 2, kind: input, shape index: {}]   ;;  %s352_s3 = inlined_call_operand.hbm [shape: bf16[64,128], index: 3, kind: output, shape index: {}]  }
   0x1   :  { %v255_v0 = vld [vmem:[%s350_s1] sm:$0x3f]   ;;  %v17_v2 = vld [vmem:[%s349_s0 + $0x8] sm:$0xff]  ;;  %v18_v7 = vld [vmem:[%s349_s0 + $0x10] sm:$0xff] }
   0x2   :  { %v16_v1 = vld [vmem:[%s349_s0] sm:$0xff]  ;;  %250 = vmatprep.subr.msk.bf16.mxu0 %vm55_vm0, %v255_v0  ;;  %251 = vmatprep.subr.msk.bf16.mxu1 %vm55_vm0, %v255_v0  ;;  %v57_v4 = vsel %vm55_vm0, %v255_v0, 0  ;;  %v21_v6 = vld [vmem:[%s349_s0 + $0x28] sm:$0xff]  ;;  %v19_v8 = vld [vmem:[%s349_s0 + $0x18] sm:$0xff] }
   0x3   :  { %v20_v3 = vld [vmem:[%s349_s0 + $0x20] sm:$0xff]  ;;  %v24_v5 = vpack.c.bf16 %v17_v2, %v16_v1  ;;  %239 = vmatpush3.bf16.msra.mxu0 %v57_v4  ;;  %249 = vmatpush3.bf16.msra.mxu1 %v57_v4  ;;  %v25_v10 = vpack.c.bf16 %v19_v8, %v18_v7  ;;  %v22_v11 = vld [vmem:[%s349_s0 + $0x30] sm:$0xff]  ;;  %v23_v12 = vld [vmem:[%s349_s0 + $0x38] sm:$0xff] }
   0x4   :  { %v26_v9 = vpack.c.bf16 %v21_v6, %v20_v3 }
   0x5   :  { %8 = vsyncpa [#allocation3], 0  ;;  %240 = vmatprep.mubr.msk.bf16.mxu0 %vm42_vm1, %v24_v5  ;;  %v27_v13 = vpack.c.bf16 %v23_v12, %v22_v11  ;;  %v188_v14 = vld [vmem:[%s351_s2] ss:$0 sm:$0xff]  ;;  %s280_s0 = smov [#allocation2]  }
   0x6   :  { %244 = vmatprep.mubr.msk.bf16.mxu1 %vm42_vm1, %v26_v9  ;;  %241 = vmatmul.mubr.msk.bf16.vlgmr.msra.gmra.mrb[0].mxu0 %vm42_vm1, %v25_v10  ;;  %s177_s4 = sshll.u32 %s280_s0, 4  ;;  %s178_s4 = int_to_ptr.vmem [resolvable:$true] %s177_s4 }
   0x7   :  { %245 = vmatmul.mubr.msk.bf16.vlgmr.msra.gmra.mrb[0].mxu1 %vm42_vm1, %v27_v13  ;;  %s256_s2 = scalar_lea.vmem %s178_s4, 512  ;;  %p261_p1 = scmp.lt.s32.totalorder %s178_s4, %s178_s4 }
   0x8   :  { %p257_p0 = scmp.ne.s32.totalorder %s178_s4, %s256_s2  ;;  %p262_p2 = scmp.lt.s32.totalorder %s256_s2, %s256_s2 }
   0xa   :  { %p263_p3 = por %p262_p2, %p261_p1 }
   0xc   :  { %p264_p4 = pnand %p263_p3, %p257_p0 }
  0xd9   :  { %v242_v15 = vpop.f32.mrb[0].mxu0 }
  0xda   :  { %v246_v16 = vpop.f32.mrb[0].mxu1  ;;  %v102_v17 = vadd.f32 %v242_v15, %v188_v14  ;;  %v93_v19 = vpop.f32.mrb[1].mxu0 }
  0xdb   :  { %v118_v18 = vadd.f32 %v246_v16, %v188_v14  ;;  %v109_v20 = vpop.f32.mrb[1].mxu1  ;;  %v94_v21 = vadd.f32 %v188_v14, %v93_v19  ;;  %v243_v23 = vpop.f32.mrb[2].mxu0 }
  0xdc   :  { %v110_v22 = vadd.f32 %v188_v14, %v109_v20  ;;  %v247_v24 = vpop.f32.mrb[2].mxu1  ;;  %v105_v25 = vadd.f32 %v243_v23, %v188_v14  ;;  %v96_v27 = vpop.f32.mrb[3].mxu0  ;;  %v126_v31 = vmax.f32 %v102_v17, 0.0 }
  0xdd   :  { %v121_v26 = vadd.f32 %v247_v24, %v188_v14  ;;  %v112_v28 = vpop.f32.mrb[3].mxu1  ;;  %v97_v29 = vadd.f32 %v188_v14, %v96_v27  ;;  %v130_v32 = vmax.f32 %v118_v18, 0.0  ;;  %v124_v35 = vmax.f32 %v94_v21, 0.0 }
  0xde   :  { %v113_v30 = vadd.f32 %v188_v14, %v112_v28  ;;  %v127_v33 = vmax.f32 %v105_v25, 0.0  ;;  %v128_v36 = vmax.f32 %v110_v22, 0.0 }
  0xdf   :  { %v131_v34 = vmax.f32 %v121_v26, 0.0  ;;  %v125_v37 = vmax.f32 %v97_v29, 0.0 }
  0xe0   :  { %v129_v38 = vmax.f32 %v113_v30, 0.0  ;;  %v218_v39 = vpack.c.bf16 %v127_v33, %v126_v31 }
  0xe1   :  { %v228_v40 = vpack.c.bf16 %v131_v34, %v130_v32  ;;  %v213_v41 = vpack.c.bf16 %v125_v37, %v124_v35 }
  0xe2   :  { %v223_v42 = vpack.c.bf16 %v129_v38, %v128_v36  ;;  %230 = vst [vmem:[#allocation2 + $0x8] sm:$0xff] %v218_v39  }
  0xe3   :  { %232 = vst [vmem:[#allocation2 + $0x18] sm:$0xff] %v228_v40   ;;  %214 = vst [vmem:[#allocation2] sm:$0xff] %v213_v41  }
  0xe4   :  { %231 = vst [vmem:[#allocation2 + $0x10] sm:$0xff] %v223_v42  }
  0xe5   :  { %267 = shalt.err (!%p264_p4)
}
  0xe6   :  { %s268_s7 = scalar_lea.hbm %s352_s3, 512 }
  0xe7   :  { %p269_p5 = scmp.ne.s32.totalorder %s352_s3, %s268_s7  ;;  %p272_p6 = scmp.lt.u32.totalorder %s268_s7, %s352_s3 }
  0xe9   :  { %p274_p7 = pnand %p272_p6, %p269_p5 }
  0xeb   :  { %277 = shalt.err (!%p274_p7)
}
  0xec   :  { %s281_s12 = smov 64   ;;  %s282_s13 = smov 4  }
  0xed   :  { %183 = dma.vmem_to_hbm [thread:$0]  %s178_s4, 512, %s352_s3, [#allocation3], %s281_s12, %s281_s12, %s282_s13  }
  0xee   :  { %278 = dma.done.wait [#allocation3], 512  }
  0xef   :  { %279 = vsyncadd [#allocation3], 4294966784 }
  0xf0   :  { %187 = vsyncpa [#allocation3], 1 }

</bundles_post_ra>
